<compile_context>
chip_gen: v7x
topology: tpu7x:2x2x1
jax: 0.10.0
libtpu: 0.0.40
codegen_flags: <defaults>
</compile_context>

<pallas_src>
import functools

import jax
import jax.numpy as jnp
from jax.experimental import pallas as pl
from jax.experimental.pallas import tpu as pltpu

LANE = 128
_VMEM_LIMIT = 32 * 1024 * 1024   # ~32 MiB: safe on v5e/v6e (128 MiB) and v7x (64 MiB)


def _round_up(x, m):
    return ((x + m - 1) // m) * m


def _cdiv(a, b):
    return (a + b - 1) // b


# ----------------------------- Pallas kernels ------------------------------

def _conv_epilogue(acc, bias_ref, o_ref, stats_ref, row0, m_true):
    """Add bias, store the bf16 activation tile (lane-dense) and the per-tile
    BN partial sums / sums-of-squares.  Padded M rows are masked out of the
    statistics.  `row0` is a plain value (program_id was read at top level)."""
    acc = acc + bias_ref[...]                                    # (tm, tn) f32
    o_ref[...] = acc.astype(o_ref.dtype)                         # bf16, lane-dense
    rows = jax.lax.broadcasted_iota(jnp.int32, acc.shape, 0) + row0
    valid = (rows < m_true).astype(jnp.float32)
    av = acc * valid
    # Write the two stats rows directly; rows 2..7 of the block stay unwritten
    # (never read on the host side).
    stats_ref[0, 0:1, :] = jnp.sum(av, axis=0, keepdims=True)         # sum
    stats_ref[0, 1:2, :] = jnp.sum(av * acc, axis=0, keepdims=True)   # sum of sq.


def _conv_mm_kernel_single_k(a_ref, w_ref, bias_ref, o_ref, stats_ref, *, m_true, tm):
    """K fits in one tile: one MXU matmul, no accumulator scratch, no pl.when."""
    row0 = pl.program_id(0) * tm        # program_id only at kernel top level
    acc = jnp.dot(a_ref[...], w_ref[...], preferred_element_type=jnp.float32)
    _conv_epilogue(acc, bias_ref, o_ref, stats_ref, row0, m_true)


def _conv_mm_kernel_multi_k(a_ref, w_ref, bias_ref, o_ref, stats_ref, acc_ref, *,
                            m_true, tm):
    """K reduction over grid axis 2 with a resident f32 VMEM accumulator."""
    row0 = pl.program_id(0) * tm        # hoisted: never call program_id in pl.when
    ki = pl.program_id(2)
    nk = pl.num_programs(2)

    @pl.when(ki == 0)
    def _():
        acc_ref[...] = jnp.zeros_like(acc_ref)

    acc_ref[...] += jnp.dot(a_ref[...], w_ref[...],
                            preferred_element_type=jnp.float32)

    @pl.when(ki == nk - 1)
    def _():
        _conv_epilogue(acc_ref[...], bias_ref, o_ref, stats_ref, row0, m_true)


def _bn_silu_kernel(y_ref, scale_ref, shift_ref, o_ref):
    """Fused BN affine + SiLU on a lane-dense (tm, c_pad) tile.
    bf16 in (halved HBM read), f32 math (no bf16 VPU/EUP on v5e), f32 out."""
    y = y_ref[...].astype(jnp.float32) * scale_ref[...] + shift_ref[...]
    o_ref[...] = y * jax.nn.sigmoid(y)


# ------------------------------- glue (JAX) --------------------------------

def _im2col(x, kh, kw, stride, pad):
    """x: (N, C, H, W) -> patches (N*Ho*Wo, C*kh*kw) in PyTorch Conv2d weight
    flattening order (C_in-major, then kh, then kw)."""
    n, c, h, w = x.shape
    xp = jnp.pad(x, ((0, 0), (0, 0), (pad, pad), (pad, pad)))
    ho = (h + 2 * pad - kh) // stride + 1
    wo = (w + 2 * pad - kw) // stride + 1
    cols = []
    for i in range(kh):
        for j in range(kw):
            cols.append(xp[:, :, i:i + stride * ho:stride, j:j + stride * wo:stride])
    cols = jnp.stack(cols, axis=2)                      # (N, C, kh*kw, Ho, Wo)
    cols = cols.transpose(0, 3, 4, 1, 2)                # (N, Ho, Wo, C, kh*kw)
    return cols.reshape(n * ho * wo, c * kh * kw), ho, wo


@functools.partial(jax.jit, static_argnames=("stride",))
def conv_block_forward(x, weight, bias, gamma, beta, *, stride=2, eps=1e-5):
    """Conv2d(3x3, stride, pad=1) -> BatchNorm2d (training-mode batch stats)
    -> SiLU.  x: (N, Cin, H, W) f32.  Returns (N, Cout, Ho, Wo) f32."""
    n, cin, h, w = x.shape
    cout = weight.shape[0]
    kh = kw = 3
    c_pad = _round_up(cout, LANE)

    # bf16 im2col patches (MXU-friendly; see TODO about building these in-kernel).
    patches, ho, wo = _im2col(x.astype(jnp.bfloat16), kh, kw, stride, pad=1)
    m, k = patches.shape

    # --- tiling ---
    # M: large tiles, but ensure >= 2 M steps when possible (v7x megacore).
    tm = max(16, min(512, _round_up(_cdiv(m, 2), 16)))
    m_pad = _round_up(m, tm)
    n_mt = m_pad // tm
    # K: 128-aligned -> dense A/W vregs, unmasked loads, better MXU K utilization.
    k_pad = _round_up(k, LANE)
    if k_pad <= 512:
        tk = k_pad
    else:
        tk = next(c for c in (512, 384, 256, 128) if k_pad % c == 0)
    n_kt = k_pad // tk
    # N (Cout): 256-wide result tiles when Cout is large (v6e/v7x MXU width).
    if c_pad <= 256:
        tn = c_pad
    elif c_pad % 256 == 0:
        tn = 256
    else:
        tn = 128
    n_nt = c_pad // tn

    patches = jnp.pad(patches, ((0, m_pad - m), (0, k_pad - k)))
    w_flat = jnp.pad(weight.reshape(cout, cin * kh * kw).T.astype(jnp.bfloat16),
                     ((0, k_pad - k), (0, c_pad - cout)))
    bias2d = jnp.pad(bias, (0, c_pad - cout)).reshape(1, c_pad).astype(jnp.float32)

    if n_kt == 1:
        conv_kernel = functools.partial(_conv_mm_kernel_single_k, m_true=m, tm=tm)
        scratch = []                                     # no accumulator needed
    else:
        conv_kernel = functools.partial(_conv_mm_kernel_multi_k, m_true=m, tm=tm)
        scratch = [pltpu.VMEM((tm, tn), jnp.float32)]

    # ---- Pallas conv-as-matmul + fused BN partial statistics ----
    conv_out, stats = pl.pallas_call(
        conv_kernel,
        out_shape=(jax.ShapeDtypeStruct((m_pad, c_pad), jnp.bfloat16),
                   jax.ShapeDtypeStruct((n_mt, 8, c_pad), jnp.float32)),
        grid_spec=pltpu.PrefetchScalarGridSpec(
            num_scalar_prefetch=0,
            grid=(n_mt, n_nt, n_kt),
            in_specs=[
                pl.BlockSpec((tm, tk), lambda i, j, kk: (i, kk)),
                pl.BlockSpec((tk, tn), lambda i, j, kk: (kk, j)),
                pl.BlockSpec((1, tn), lambda i, j, kk: (0, j)),
            ],
            out_specs=[
                pl.BlockSpec((tm, tn), lambda i, j, kk: (i, j)),
                pl.BlockSpec((1, 8, tn), lambda i, j, kk: (i, 0, j)),
            ],
            scratch_shapes=scratch,
        ),
        compiler_params=pltpu.CompilerParams(
            dimension_semantics=("parallel", "parallel", "arbitrary"),
            vmem_limit_bytes=_VMEM_LIMIT),
    )(patches, w_flat, bias2d)

    # Finish BN batch statistics on small (c_pad,) vectors.
    s1 = jnp.sum(stats[:, 0, :], axis=0)
    s2 = jnp.sum(stats[:, 1, :], axis=0)
    mean = s1 / m
    var = jnp.maximum(s2 / m - mean * mean, 0.0)         # biased, PyTorch training mode
    gamma_p = jnp.pad(gamma, (0, c_pad - cout))          # zero-padded lanes -> scale 0
    beta_p = jnp.pad(beta, (0, c_pad - cout))
    scale_v = gamma_p * jax.lax.rsqrt(var + eps)
    shift_v = beta_p - mean * scale_v
    scale = scale_v.reshape(1, c_pad).astype(jnp.float32)
    shift = shift_v.reshape(1, c_pad).astype(jnp.float32)

    # ---- Pallas fused BN-apply + SiLU (lane-dense NHWC tiles) ----
    out2d = pl.pallas_call(
        _bn_silu_kernel,
        out_shape=jax.ShapeDtypeStruct((m_pad, c_pad), jnp.float32),
        grid_spec=pltpu.PrefetchScalarGridSpec(
            num_scalar_prefetch=0,
            grid=(n_mt,),
            in_specs=[
                pl.BlockSpec((tm, c_pad), lambda i: (i, 0)),
                pl.BlockSpec((1, c_pad), lambda i: (0, 0)),
                pl.BlockSpec((1, c_pad), lambda i: (0, 0)),
            ],
            out_specs=pl.BlockSpec((tm, c_pad), lambda i: (i, 0)),
        ),
        compiler_params=pltpu.CompilerParams(
            dimension_semantics=("parallel",),
            vmem_limit_bytes=_VMEM_LIMIT),
    )(conv_out, scale, shift)

    # NHWC -> NCHW permute left to XLA so the kernel stores stay unmasked.
    out = out2d[:m, :cout].reshape(n, ho, wo, cout).transpose(0, 3, 1, 2)
    return out


# ------------------------------ reference (JAX) -----------------------------

def _reference(x, weight, bias, gamma, beta, stride=2, eps=1e-5):
    conv = jax.lax.conv_general_dilated(
        x, weight, window_strides=(stride, stride), padding=((1, 1), (1, 1)),
        dimension_numbers=("NCHW", "OIHW", "NCHW"))
    conv = conv + bias.reshape(1, -1, 1, 1)
    mean = jnp.mean(conv, axis=(0, 2, 3), keepdims=True)
    var = jnp.mean(jnp.square(conv - mean), axis=(0, 2, 3), keepdims=True)
    y = (conv - mean) / jnp.sqrt(var + eps)
    y = y * gamma.reshape(1, -1, 1, 1) + beta.reshape(1, -1, 1, 1)
    return y * jax.nn.sigmoid(y)


# ---------------------------------- main ------------------------------------

if __name__ == "__main__":
    key = jax.random.PRNGKey(0)
    k_x, k_w, k_b = jax.random.split(key, 3)

    N, Cin, H, W = 2, 4, 16, 16
    Cout, stride = 8, 2

    x = jax.random.normal(k_x, (N, Cin, H, W), dtype=jnp.float32)
    fan_in = Cin * 3 * 3
    bound = 1.0 / (fan_in ** 0.5)
    weight = jax.random.uniform(k_w, (Cout, Cin, 3, 3), jnp.float32, -bound, bound)
    bias = jax.random.uniform(k_b, (Cout,), jnp.float32, -bound, bound)
    gamma = jnp.ones((Cout,), jnp.float32)
    beta = jnp.zeros((Cout,), jnp.float32)

    out = conv_block_forward(x, weight, bias, gamma, beta, stride=stride)
    out = jax.block_until_ready(out)

    ref = _reference(x, weight, bias, gamma, beta, stride=stride)
    assert out.shape == (N, Cout, H // stride, W // stride), out.shape
    # bf16 MXU operands / bf16 intermediate (f32 accumulation and BN math)
    # -> tolerance loosened vs. pure-f32.
    assert jnp.max(jnp.abs(out - ref)) < 5e-2, float(jnp.max(jnp.abs(out - ref)))

    print("KERNEL_OK")
</pallas_src>

<mosaic_0001>
module attributes {stable_mosaic.version = 11 : i64} {
  func.func @_conv_mm_kernel_single_k(%arg0: i32, %arg1: i32, %arg2: i32, %arg3: memref<64x128xbf16, #tpu.memory_space<vmem>>, %arg4: memref<128x128xbf16, #tpu.memory_space<vmem>>, %arg5: memref<1x128xf32, #tpu.memory_space<vmem>>, %arg6: memref<64x128xbf16, #tpu.memory_space<vmem>>, %arg7: memref<1x8x128xf32, #tpu.memory_space<vmem>>) attributes {dimension_semantics = [#tpu.dimension_semantics<parallel>, #tpu.dimension_semantics<parallel>, #tpu.dimension_semantics<arbitrary>], iteration_bounds = array<i64: 2, 1, 1>, scalar_prefetch = 0 : i64, scratch_operands = 0 : i64, tpu.core_type = #tpu.core_type<tc>, window_params = [{transform_indices = @transform_0, window_bounds = array<i64: 64, 128>}, {transform_indices = @transform_1, window_bounds = array<i64: 128, 128>}, {transform_indices = @transform_2, window_bounds = array<i64: 1, 128>}, {transform_indices = @transform_3, window_bounds = array<i64: 64, 128>}, {transform_indices = @transform_4, window_bounds = array<i64: 1, 8, 128>}]} {
    %c64_i32 = arith.constant 64 : i32
    %0 = arith.muli %arg0, %c64_i32 : i32
    %c0 = arith.constant 0 : index
    %c0_0 = arith.constant 0 : index
    %1 = vector.load %arg3[%c0, %c0_0] : memref<64x128xbf16, #tpu.memory_space<vmem>>, vector<64x128xbf16>
    %c0_1 = arith.constant 0 : index
    %c0_2 = arith.constant 0 : index
    %2 = vector.load %arg4[%c0_1, %c0_2] : memref<128x128xbf16, #tpu.memory_space<vmem>>, vector<128x128xbf16>
    %cst = arith.constant dense<0.000000e+00> : vector<64x128xf32>
    %3 = tpu.matmul %1, %2, %cst {dimension_numbers = #tpu.dot_dimension_numbers<[1], [0], [0], [1], [0, 0, 1, 1], [], []>} : vector<64x128xbf16>, vector<128x128xbf16>, vector<64x128xf32> -> vector<64x128xf32>
    %c0_3 = arith.constant 0 : index
    %c0_4 = arith.constant 0 : index
    %4 = vector.load %arg5[%c0_3, %c0_4] : memref<1x128xf32, #tpu.memory_space<vmem>>, vector<1x128xf32>
    %5 = vector.broadcast %4 : vector<1x128xf32> to vector<64x128xf32>
    %6 = arith.addf %3, %5 : vector<64x128xf32>
    %7 = arith.truncf %6 : vector<64x128xf32> to vector<64x128xbf16>
    %c0_5 = arith.constant 0 : index
    %c0_6 = arith.constant 0 : index
    %8 = vector.load %arg6[%c0_5, %c0_6] : memref<64x128xbf16, #tpu.memory_space<vmem>>, vector<64x128xbf16>
    tpu.vector_store %arg6[%c0_5, %c0_6], %7 {strides = array<i32>} : memref<64x128xbf16, #tpu.memory_space<vmem>>, vector<64x128xbf16>,
    %9 = tpu.iota {dimensions = array<i32: 0>} : vector<64x128xi32>
    %10 = vector.broadcast %0 : i32 to vector<64x128xi32>
    %11 = arith.addi %9, %10 : vector<64x128xi32>
    %c128_i32 = arith.constant 128 : i32
    %12 = vector.broadcast %c128_i32 : i32 to vector<64x128xi32>
    %13 = arith.cmpi slt, %11, %12 : vector<64x128xi32>
    %14 = arith.extui %13 : vector<64x128xi1> to vector<64x128xi32>
    %15 = arith.sitofp %14 : vector<64x128xi32> to vector<64x128xf32>
    %16 = arith.mulf %6, %15 : vector<64x128xf32>
    %cst_7 = arith.constant dense<0.000000e+00> : vector<128xf32>
    %17 = vector.multi_reduction <add>, %16, %cst_7 [0] : vector<64x128xf32> to vector<128xf32>
    %18 = vector.shape_cast %17 : vector<128xf32> to vector<1x128xf32>
    %c0_8 = arith.constant 0 : index
    %c0_9 = arith.constant 0 : index
    %c0_10 = arith.constant 0 : index
    %19 = vector.load %arg7[%c0_8, %c0_9, %c0_10] : memref<1x8x128xf32, #tpu.memory_space<vmem>>, vector<1x1x128xf32>
    %20 = vector.shape_cast %19 : vector<1x1x128xf32> to vector<1x128xf32>
    %21 = vector.shape_cast %18 : vector<1x128xf32> to vector<1x1x128xf32>
    tpu.vector_store %arg7[%c0_8, %c0_9, %c0_10], %21 {strides = array<i32>} : memref<1x8x128xf32, #tpu.memory_space<vmem>>, vector<1x1x128xf32>,
    %22 = arith.mulf %16, %6 : vector<64x128xf32>
    %cst_11 = arith.constant dense<0.000000e+00> : vector<128xf32>
    %23 = vector.multi_reduction <add>, %22, %cst_11 [0] : vector<64x128xf32> to vector<128xf32>
    %24 = vector.shape_cast %23 : vector<128xf32> to vector<1x128xf32>
    %c0_12 = arith.constant 0 : index
    %c1 = arith.constant 1 : index
    %c0_13 = arith.constant 0 : index
    %25 = vector.load %arg7[%c0_12, %c1, %c0_13] : memref<1x8x128xf32, #tpu.memory_space<vmem>>, vector<1x1x128xf32>
    %26 = vector.shape_cast %25 : vector<1x1x128xf32> to vector<1x128xf32>
    %27 = vector.shape_cast %24 : vector<1x128xf32> to vector<1x1x128xf32>
    tpu.vector_store %arg7[%c0_12, %c1, %c0_13], %27 {strides = array<i32>} : memref<1x8x128xf32, #tpu.memory_space<vmem>>, vector<1x1x128xf32>,
    return
  }
  func.func @transform_0(%arg0: i32, %arg1: i32, %arg2: i32) -> (i32, i32) {
    %c0_i32 = arith.constant 0 : i32
    return %arg0, %arg2 : i32, i32
  }
  func.func @transform_1(%arg0: i32, %arg1: i32, %arg2: i32) -> (i32, i32) {
    %c0_i32 = arith.constant 0 : i32
    return %arg2, %arg1 : i32, i32
  }
  func.func @transform_2(%arg0: i32, %arg1: i32, %arg2: i32) -> (i32, i32) {
    %c0_i32 = arith.constant 0 : i32
    %c0_i32_0 = arith.constant 0 : i32
    return %c0_i32, %arg1 : i32, i32
  }
  func.func @transform_3(%arg0: i32, %arg1: i32, %arg2: i32) -> (i32, i32) {
    %c0_i32 = arith.constant 0 : i32
    return %arg0, %arg1 : i32, i32
  }
  func.func @transform_4(%arg0: i32, %arg1: i32, %arg2: i32) -> (i32, i32, i32) {
    %c0_i32 = arith.constant 0 : i32
    %c0_i32_0 = arith.constant 0 : i32
    return %arg0, %c0_i32, %arg1 : i32, i32, i32
  }
}

module attributes {stable_mosaic.version = 11 : i64} {
  func.func @_bn_silu_kernel(%arg0: i32, %arg1: memref<64x128xbf16, #tpu.memory_space<vmem>>, %arg2: memref<1x128xf32, #tpu.memory_space<vmem>>, %arg3: memref<1x128xf32, #tpu.memory_space<vmem>>, %arg4: memref<64x128xf32, #tpu.memory_space<vmem>>) attributes {dimension_semantics = [#tpu.dimension_semantics<parallel>], iteration_bounds = array<i64: 2>, scalar_prefetch = 0 : i64, scratch_operands = 0 : i64, tpu.core_type = #tpu.core_type<tc>, window_params = [{transform_indices = @transform_0, window_bounds = array<i64: 64, 128>}, {pipeline_mode = #tpu.pipeline_mode<synchronous>, transform_indices = @transform_1, window_bounds = array<i64: 1, 128>}, {pipeline_mode = #tpu.pipeline_mode<synchronous>, transform_indices = @transform_2, window_bounds = array<i64: 1, 128>}, {transform_indices = @transform_3, window_bounds = array<i64: 64, 128>}]} {
    %c0 = arith.constant 0 : index
    %c0_0 = arith.constant 0 : index
    %0 = vector.load %arg1[%c0, %c0_0] : memref<64x128xbf16, #tpu.memory_space<vmem>>, vector<64x128xbf16>
    %1 = arith.extf %0 : vector<64x128xbf16> to vector<64x128xf32>
    %c0_1 = arith.constant 0 : index
    %c0_2 = arith.constant 0 : index
    %2 = vector.load %arg2[%c0_1, %c0_2] : memref<1x128xf32, #tpu.memory_space<vmem>>, vector<1x128xf32>
    %3 = vector.broadcast %2 : vector<1x128xf32> to vector<64x128xf32>
    %4 = arith.mulf %1, %3 : vector<64x128xf32>
    %c0_3 = arith.constant 0 : index
    %c0_4 = arith.constant 0 : index
    %5 = vector.load %arg3[%c0_3, %c0_4] : memref<1x128xf32, #tpu.memory_space<vmem>>, vector<1x128xf32>
    %6 = vector.broadcast %5 : vector<1x128xf32> to vector<64x128xf32>
    %7 = arith.addf %4, %6 : vector<64x128xf32>
    %8 = arith.negf %7 : vector<64x128xf32>
    %9 = math.exp %8 : vector<64x128xf32>
    %cst = arith.constant 1.000000e+00 : f32
    %10 = vector.broadcast %cst : f32 to vector<64x128xf32>
    %11 = arith.addf %10, %9 : vector<64x128xf32>
    %12 = arith.divf %10, %11 : vector<64x128xf32>
    %13 = arith.mulf %7, %12 : vector<64x128xf32>
    %c0_5 = arith.constant 0 : index
    %c0_6 = arith.constant 0 : index
    %14 = vector.load %arg4[%c0_5, %c0_6] : memref<64x128xf32, #tpu.memory_space<vmem>>, vector<64x128xf32>
    tpu.vector_store %arg4[%c0_5, %c0_6], %13 {strides = array<i32>} : memref<64x128xf32, #tpu.memory_space<vmem>>, vector<64x128xf32>,
    return
  }
  func.func @transform_0(%arg0: i32) -> (i32, i32) {
    %c0_i32 = arith.constant 0 : i32
    %c0_i32_0 = arith.constant 0 : i32
    return %arg0, %c0_i32 : i32, i32
  }
  func.func @transform_1(%arg0: i32) -> (i32, i32) {
    %c0_i32 = arith.constant 0 : i32
    %c0_i32_0 = arith.constant 0 : i32
    %c0_i32_1 = arith.constant 0 : i32
    return %c0_i32, %c0_i32_0 : i32, i32
  }
  func.func @transform_2(%arg0: i32) -> (i32, i32) {
    %c0_i32 = arith.constant 0 : i32
    %c0_i32_0 = arith.constant 0 : i32
    %c0_i32_1 = arith.constant 0 : i32
    return %c0_i32, %c0_i32_0 : i32, i32
  }
  func.func @transform_3(%arg0: i32) -> (i32, i32) {
    %c0_i32 = arith.constant 0 : i32
    %c0_i32_0 = arith.constant 0 : i32
    return %arg0, %c0_i32 : i32, i32
  }
}

</mosaic_0001>

<bundles_post_ra>
// kernel: conv_block_forward.3
= control target key start
LH: loop header
LB: loop body
LE: loop exit
PB: predicated region body
PF: predicated region fallthrough
CT: control target
= control target key end

     0   :  { %s448_s12 = smov 0   ;;  %s475_s0 = inlined_call_operand.vmem [shape: bf16[128,128], index: 0, kind: input, shape index: {}]   ;;  %s476_s1 = inlined_call_operand.vmem [shape: f32[1,128], index: 1, kind: input, shape index: {}]   ;;  %s477_s2 = inlined_call_operand.vmem [shape: f32[1,128], index: 2, kind: input, shape index: {}]   ;;  %s478_s3 = inlined_call_operand.vmem [shape: f32[128,128], index: 3, kind: output, shape index: {}]  }
   0x1 LB: > { %s340_s13 = sadd.s32 4294967295, %s426_s12   ;;  %p344_p0 = scmp.ge.s32.totalorder %s426_s12, 1  ;;  %s426_s12 = sphi %s448_s12, %s13_s12  }
   0x2   : > { %p138_p1 = scmp.lt.s32.totalorder %s426_s12, 3 }
   0x4   : > { %p139_p2 = pnand %p344_p0, %p138_p1 }
   0x5   : > { %s345_s14 = sshll.u32 (!%p139_p2), %s340_s13, 3  ;;  %v349_v0 = vld [vmem:[%s476_s1] ss:$0 sm:$0xff] (!%p139_p2) }
   0x6   : > { %142 = sbr.rel (%p139_p2) target bundleno = 59 (0x3b), region = 32  ;;  %p163_p3 = scmp.lt.s32.totalorder (!%p139_p2), %s345_s14, 15  ;;  %v350_v9 = vld [vmem:[%s477_s2] ss:$0 sm:$0xff] (!%p139_p2) }
   0xd   : > { %s480_s14 = smov (!%p163_p3, %s345_s14), 15 }
   0xe   : > { %s346_s15 = sshll.u32 %s480_s14, 2  ;;  %s348_s23 = sshll.u32 %s480_s14, 3 }
   0xf   : > { %s166_s18 = scalar_lea.vmem %s475_s0, %s346_s15  ;;  %s172_s26 = scalar_lea.vmem %s478_s3, %s348_s23 }
  0x10   : > { %v362_v1 = vld [vmem:[%s166_s18] sm:$0xff]   ;;  %v377_v2 = vld [vmem:[%s166_s18 + $0x8] sm:$0xff]   ;;  %v378_v3 = vld [vmem:[%s166_s18 + $0x10] sm:$0xff]  }
  0x11   : > { %v363_v4 = vunpack.c.l.bf16 %v362_v1  ;;  %v364_v5 = vunpack.c.h.bf16 %v362_v1  ;;  %v367_v6 = vunpack.c.l.bf16 %v377_v2  ;;  %v368_v7 = vunpack.c.h.bf16 %v377_v2  ;;  %v379_v8 = vld [vmem:[%s166_s18 + $0x18] sm:$0xff]  }
  0x12   : > { %v371_v10 = vunpack.c.l.bf16 %v378_v3  ;;  %v372_v11 = vunpack.c.h.bf16 %v378_v3  ;;  %v375_v12 = vunpack.c.l.bf16 %v379_v8  ;;  %v376_v13 = vunpack.c.h.bf16 %v379_v8 }
  0x13   : > { %v197_v14 = vmul.f32 %v363_v4, %v349_v0  ;;  %v198_v15 = vmul.f32 %v364_v5, %v349_v0  ;;  %v199_v16 = vmul.f32 %v367_v6, %v349_v0  ;;  %v200_v17 = vmul.f32 %v368_v7, %v349_v0 }
  0x14   : > { %v201_v18 = vmul.f32 %v371_v10, %v349_v0  ;;  %v202_v19 = vmul.f32 %v372_v11, %v349_v0  ;;  %v203_v20 = vmul.f32 %v375_v12, %v349_v0  ;;  %v204_v21 = vmul.f32 %v376_v13, %v349_v0 }
  0x15   : > { %v212_v22 = vadd.f32 %v350_v9, %v197_v14  ;;  %v213_v23 = vadd.f32 %v350_v9, %v198_v15  ;;  %v214_v24 = vadd.f32 %v350_v9, %v199_v16  ;;  %v215_v25 = vadd.f32 %v350_v9, %v200_v17 }
  0x16   : > { %v216_v26 = vadd.f32 %v350_v9, %v201_v18  ;;  %v217_v27 = vadd.f32 %v350_v9, %v202_v19  ;;  %v218_v31 = vadd.f32 %v350_v9, %v203_v20  ;;  %v219_v33 = vadd.f32 %v350_v9, %v204_v21 }
  0x17   : > { %v351_v28 = vmul.f32 -1.442695, %v212_v22  ;;  %v352_v29 = vmul.f32 -1.442695, %v213_v23  ;;  %v353_v30 = vmul.f32 -1.442695, %v214_v24 }
  0x18   : > { %v354_v32 = vmul.f32 -1.442695, %v215_v25  ;;  %v355_v34 = vmul.f32 -1.442695, %v216_v26  ;;  %v356_v35 = vmul.f32 -1.442695, %v217_v27 }
  0x19   : > { %388 = vpow2.f32 %v351_v28  ;;  %v357_v36 = vmul.f32 -1.442695, %v218_v31  ;;  %v358_v37 = vmul.f32 -1.442695, %v219_v33 }
  0x1a   : > { %390 = vpow2.f32 %v352_v29 }
  0x1b   : > { %392 = vpow2.f32 %v353_v30 }
  0x1c   : > { %394 = vpow2.f32 %v354_v32 }
  0x1d   : > { %396 = vpow2.f32 %v355_v34 }
  0x1e   : > { %398 = vpow2.f32 %v356_v35 }
  0x1f   : > { %400 = vpow2.f32 %v357_v36 }
  0x20   : > { %402 = vpow2.f32 %v358_v37 }
  0x23   : > { %v389_v38 = vpop.eup %388 }
  0x24   : > { %v391_v39 = vpop.eup %390  ;;  %v244_v40 = vadd.f32 1.0, %v389_v38 }
  0x25   : > { %v393_v41 = vpop.eup %392  ;;  %v245_v42 = vadd.f32 1.0, %v391_v39 }
  0x26   : > { %v395_v43 = vpop.eup %394  ;;  %404 = vrcp.f32 %v244_v40  ;;  %v246_v44 = vadd.f32 1.0, %v393_v41 }
  0x27   : > { %v397_v45 = vpop.eup %396  ;;  %406 = vrcp.f32 %v245_v42  ;;  %v247_v46 = vadd.f32 1.0, %v395_v43 }
  0x28   : > { %v399_v47 = vpop.eup %398  ;;  %408 = vrcp.f32 %v246_v44  ;;  %v248_v48 = vadd.f32 1.0, %v397_v45 }
  0x29   : > { %v401_v49 = vpop.eup %400  ;;  %410 = vrcp.f32 %v247_v46  ;;  %v249_v50 = vadd.f32 1.0, %v399_v47 }
  0x2a   : > { %v403_v51 = vpop.eup %402  ;;  %412 = vrcp.f32 %v248_v48  ;;  %v250_v52 = vadd.f32 1.0, %v401_v49 }
  0x2b   : > { %414 = vrcp.f32 %v249_v50  ;;  %v251_v53 = vadd.f32 1.0, %v403_v51 }
  0x2c   : > { %416 = vrcp.f32 %v250_v52 }
  0x2d   : > { %418 = vrcp.f32 %v251_v53 }
  0x30   : > { %v405_v54 = vpop.eup %404 }
  0x31   : > { %v407_v55 = vpop.eup %406  ;;  %v268_v56 = vmul.f32 %v405_v54, %v212_v22 }
  0x32   : > { %v409_v57 = vpop.eup %408  ;;  %v269_v58 = vmul.f32 %v407_v55, %v213_v23 }
  0x33   : > { %v411_v59 = vpop.eup %410  ;;  %276 = vst [vmem:[%s172_s26] sm:$0xff] %v268_v56  ;;  %v270_v60 = vmul.f32 %v409_v57, %v214_v24 }
  0x34   : > { %v413_v61 = vpop.eup %412  ;;  %277 = vst [vmem:[%s172_s26 + $0x8] sm:$0xff] %v269_v58  ;;  %v271_v62 = vmul.f32 %v411_v59, %v215_v25 }
  0x35   : > { %v415_v63 = vpop.eup %414  ;;  %278 = vst [vmem:[%s172_s26 + $0x10] sm:$0xff] %v270_v60  ;;  %v272_v0 = vmul.f32 %v413_v61, %v216_v26 }
  0x36   : > { %v417_v1 = vpop.eup %416  ;;  %279 = vst [vmem:[%s172_s26 + $0x18] sm:$0xff] %v271_v62  ;;  %v273_v2 = vmul.f32 %v415_v63, %v217_v27 }
  0x37   : > { %v419_v3 = vpop.eup %418  ;;  %280 = vst [vmem:[%s172_s26 + $0x20] sm:$0xff] %v272_v0  ;;  %v274_v4 = vmul.f32 %v417_v1, %v218_v31 }
  0x38   : > { %281 = vst [vmem:[%s172_s26 + $0x28] sm:$0xff] %v273_v2  ;;  %v275_v5 = vmul.f32 %v419_v3, %v219_v33 }
  0x39   : > { %282 = vst [vmem:[%s172_s26 + $0x30] sm:$0xff] %v274_v4 }
  0x3a   : > { %283 = vst [vmem:[%s172_s26 + $0x38] sm:$0xff] %v275_v5 }
  0x3b PF: > { %s13_s12 = sadd.s32 1, %s426_s12  }
  0x3c   : > { %p10_p4 = scmp.ge.s32.totalorder %s13_s12, 4  }
  0x3e   :  { %12 = sbr.rel (!%p10_p4) target bundleno = 1 (0x1), region = 62 }

// kernel: conv_block_forward.2
= control target key start
LH: loop header
LB: loop body
LE: loop exit
PB: predicated region body
PF: predicated region fallthrough
CT: control target
= control target key end

     0   :  { %s967_s15 = smov 0   ;;  %s969_s16 = smov 0   ;;  %s1051_s0 = inlined_call_operand.vmem [shape: bf16[128,128], index: 0, kind: input, shape index: {}]   ;;  %s1052_s1 = inlined_call_operand.vmem [shape: bf16[128,128], index: 1, kind: input, shape index: {}]   ;;  %s1053_s2 = inlined_call_operand.vmem [shape: f32[1,128], index: 2, kind: input, shape index: {}]   ;;  %s1054_s3 = inlined_call_operand.vmem [shape: bf16[128,128], index: 3, kind: output, shape index: {0}]   ;;  %s1055_s4 = inlined_call_operand.vmem [shape: f32[2,8,128], index: 4, kind: output, shape index: {1}]  }
   0x1   :  { %s971_s17 = smov 0  }
   0x2 LB: > { %s34_s18 = sadd.s32 1, %s935_s16  ;;  %p759_p0 = scmp.ge.s32.totalorder %s939_s17, 1  ;;  %s939_s17 = sphi %s971_s17, %s15_s17   ;;  %s935_s16 = sphi %s969_s16, %s1057_s16   ;;  %s931_s15 = sphi %s967_s15, %s1056_s15  }
   0x3   : > { %p36_p1 = scmp.ge.s32.totalorder %s34_s18, 2  ;;  %p218_p2 = scmp.lt.s32.totalorder %s939_s17, 3 }
   0x5   : > { %s1059_s18 = smov (%p36_p1, %s34_s18), 0  ;;  %p219_p3 = pnand %p759_p0, %p218_p2 }
   0x6   : > { %v905_v0 = vld [vmem:[%s1052_s1] sm:$0xff] (!%p219_p3)   ;;  %s760_s21 = sshll.u32 (!%p219_p3), %s931_s15, 3  ;;  %v906_v1 = vld [vmem:[%s1052_s1 + $0x8] sm:$0xff] (!%p219_p3)   ;;  %v907_v2 = vld [vmem:[%s1052_s1 + $0x10] sm:$0xff] (!%p219_p3)   ;;  %v515_v12 = vlaneseq (!%p219_p3)  ;;  %s765_s14 = sshll.u32 (!%p219_p3), %s931_s15, 6  ;;  %v941_v30 = vmov (!%p219_p3), 0.0  }
   0x7   : > { %222 = sbr.rel (%p219_p3) target bundleno = 287 (0x11f), region = 32  ;;  %p269_p4 = scmp.lt.s32.totalorder (!%p219_p3), %s760_s21, 15  ;;  %840 = vmatprep.subr.bf16.mxu0 (!%p219_p3), %v905_v0  ;;  %864 = vmatprep.subr.bf16.mxu1 (!%p219_p3), %v905_v0  ;;  %v908_v3 = vld [vmem:[%s1052_s1 + $0x18] sm:$0xff] (!%p219_p3)   ;;  %v909_v6 = vld [vmem:[%s1052_s1 + $0x20] sm:$0xff] (!%p219_p3)   ;;  %v910_v7 = vld [vmem:[%s1052_s1 + $0x28] sm:$0xff] (!%p219_p3)   ;;  %v524_v15 = vstv (!%p219_p3), %s765_s14 }
   0x8   : > { %841 = vmatpush3.bf16.msra.mxu0 (!%p219_p3), %v905_v0  ;;  %872 = vmatpush3.bf16.msra.mxu1 (!%p219_p3), %v905_v0  ;;  %v911_v8 = vld [vmem:[%s1052_s1 + $0x30] sm:$0xff] (!%p219_p3)   ;;  %v912_v9 = vld [vmem:[%s1052_s1 + $0x38] sm:$0xff] (!%p219_p3)   ;;  %v516_v13 = vshrl.u32 (!%p219_p3), %v515_v12, 7  ;;  %v766_v24 = vld [vmem:[%s1053_s2] ss:$0 sm:$0xff] (!%p219_p3)  ;;  %p298_p5 = scmp.lt.s32.totalorder (!%p219_p3), %s931_s15, 1 }
   0x9   : > { %842 = vmatprep.subr.bf16.mxu0 (!%p219_p3), %v906_v1  ;;  %865 = vmatprep.subr.bf16.mxu1 (!%p219_p3), %v906_v1 }
   0xa   : > { %v518_v14 = vadd.s32 (!%p219_p3), 16, %v516_v13  ;;  %v519_v16 = vadd.s32 (!%p219_p3), 24, %v516_v13  ;;  %v517_v17 = vadd.s32 (!%p219_p3), 8, %v516_v13  ;;  %v525_v19 = vadd.s32 (!%p219_p3), %v524_v15, %v516_v13 }
   0xb   : > { %v520_v22 = vadd.s32 (!%p219_p3), 32, %v516_v13  ;;  %v521_v23 = vadd.s32 (!%p219_p3), 40, %v516_v13  ;;  %v522_v25 = vadd.s32 (!%p219_p3), 48, %v516_v13  ;;  %v523_v26 = vadd.s32 (!%p219_p3), 56, %v516_v13 }
   0xc   : > { %843 = vmatpush3.bf16.msra.mxu0 (!%p219_p3), %v906_v1  ;;  %873 = vmatpush3.bf16.msra.mxu1 (!%p219_p3), %v906_v1  ;;  %v527_v18 = vadd.s32 (!%p219_p3), %v524_v15, %v518_v14  ;;  %v528_v20 = vadd.s32 (!%p219_p3), %v524_v15, %v519_v16  ;;  %v526_v21 = vadd.s32 (!%p219_p3), %v524_v15, %v517_v17  ;;  %vm533_vm1 = vcmp.lt.s32.totalorder (!%p219_p3), %v525_v19, 128 }
   0xd   : > { %844 = vmatprep.subr.bf16.mxu0 (!%p219_p3), %v907_v2  ;;  %866 = vmatprep.subr.bf16.mxu1 (!%p219_p3), %v907_v2  ;;  %v529_v29 = vadd.s32 (!%p219_p3), %v524_v15, %v520_v22  ;;  %v787_v33 = vsel (!%p219_p3), %vm533_vm1, 1.0, %v941_v30  ;;  %v530_v40 = vadd.s32 (!%p219_p3), %v524_v15, %v521_v23  ;;  %v531_v44 = vadd.s32 (!%p219_p3), %v524_v15, %v522_v25 }
   0xe   : > { %s1061_s21 = smov (!%p269_p4, %s760_s21), 15  ;;  %vm535_vm0 = vcmp.lt.s32.totalorder %v527_v18, 128  ;;  %vm536_vm2 = vcmp.lt.s32.totalorder %v528_v20, 128  ;;  %vm534_vm3 = vcmp.lt.s32.totalorder %v526_v21, 128  ;;  %v532_v45 = vadd.s32 %v524_v15, %v523_v26  ;;  %s1063_s15 = smov (!%p298_p5, %s931_s15), 1 }
   0xf   : > { %s761_s26 = sshll.u32 %s1061_s21, 2  ;;  %v789_v31 = vsel %vm535_vm0, 1.0, %v941_v30  ;;  %v790_v38 = vsel %vm536_vm2, 1.0, %v941_v30  ;;  %v788_v43 = vsel %vm534_vm3, 1.0, %v941_v30  ;;  %vm537_vm4 = vcmp.lt.s32.totalorder %v529_v29, 128  ;;  %s764_s21 = sshll.u32 %s1063_s15, 3 }
  0x10   : > { %s1005_s29 = scalar_lea.vmem %s1051_s0, %s761_s26  ;;  %845 = vmatpush3.bf16.msra.mxu0 %v907_v2  ;;  %874 = vmatpush3.bf16.msra.mxu1 %v907_v2  ;;  %s296_s24 = scalar_lea.vmem %s1054_s3, %s761_s26  ;;  %vm538_vm5 = vcmp.lt.s32.totalorder %v530_v40, 128  ;;  %vm539_vm6 = vcmp.lt.s32.totalorder %v531_v44, 128  ;;  %v791_v57 = vsel %vm537_vm4, 1.0, %v941_v30  ;;  %vm540_vm7 = vcmp.lt.s32.totalorder %v532_v45, 128 }
  0x11   : > { %v913_v4 = vld [vmem:[%s1005_s29] sm:$0xff]   ;;  %v915_v5 = vld [vmem:[%s1005_s29 + $0x10] sm:$0xff]   ;;  %846 = vmatprep.subr.bf16.mxu0 %v908_v3  ;;  %867 = vmatprep.subr.bf16.mxu1 %v908_v3  ;;  %v914_v10 = vld [vmem:[%s1005_s29 + $0x8] sm:$0xff]   ;;  %v792_v0 = vsel %vm538_vm5, 1.0, %v941_v30  ;;  %s304_s27 = scalar_lea.vmem %s1055_s4, %s764_s21 }
  0x12   : > { %856 = vmatprep.mubr.bf16.mxu0 %v913_v4  ;;  %860 = vmatprep.mubr.bf16.mxu1 %v915_v5  ;;  %v916_v11 = vld [vmem:[%s1005_s29 + $0x18] sm:$0xff]   ;;  %v793_v5 = vsel %vm539_vm6, 1.0, %v941_v30 }
  0x14   : > { %847 = vmatpush3.bf16.msra.mxu0 %v908_v3  ;;  %875 = vmatpush3.bf16.msra.mxu1 %v908_v3 }
  0x15   : > { %848 = vmatprep.subr.bf16.mxu0 %v909_v6  ;;  %868 = vmatprep.subr.bf16.mxu1 %v909_v6 }
  0x18   : > { %849 = vmatpush3.bf16.msra.mxu0 %v909_v6  ;;  %876 = vmatpush3.bf16.msra.mxu1 %v909_v6 }
  0x19   : > { %850 = vmatprep.subr.bf16.mxu0 %v910_v7  ;;  %869 = vmatprep.subr.bf16.mxu1 %v910_v7 }
  0x1c   : > { %851 = vmatpush3.bf16.msra.mxu0 %v910_v7  ;;  %877 = vmatpush3.bf16.msra.mxu1 %v910_v7 }
  0x1d   : > { %852 = vmatprep.subr.bf16.mxu0 %v911_v8  ;;  %870 = vmatprep.subr.bf16.mxu1 %v911_v8 }
  0x20   : > { %853 = vmatpush3.bf16.msra.mxu0 %v911_v8  ;;  %878 = vmatpush3.bf16.msra.mxu1 %v911_v8 }
  0x21   : > { %854 = vmatprep.subr.bf16.mxu0 %v912_v9  ;;  %871 = vmatprep.subr.bf16.mxu1 %v912_v9 }
  0x24   : > { %855 = vmatpush3.bf16.msra.mxu0 %v912_v9  ;;  %879 = vmatpush3.bf16.msra.mxu1 %v912_v9 }
  0x27   : > { %857 = vmatmul.mubr.bf16.vlgmr.msra.gmra.mrb[0].mxu0 %v914_v10  ;;  %861 = vmatmul.mubr.bf16.vlgmr.msra.gmra.mrb[0].mxu1 %v916_v11  ;;  %v794_v10 = vsel %vm540_vm7, 1.0, %v941_v30 }
  0xfa   : > { %v858_v27 = vpop.f32.mrb[0].mxu0  ;;  %v862_v28 = vpop.f32.mrb[0].mxu1 }
  0xfb   : > { %v444_v32 = vpop.f32.mrb[1].mxu0  ;;  %v460_v34 = vpop.f32.mrb[1].mxu1  ;;  %v453_v35 = vadd.f32 %v858_v27, %v766_v24  ;;  %v469_v49 = vadd.f32 %v862_v28, %v766_v24 }
  0xfc   : > { %v445_v36 = vadd.f32 %v766_v24, %v444_v32  ;;  %v859_v37 = vpop.f32.mrb[2].mxu0  ;;  %v863_v39 = vpop.f32.mrb[2].mxu1  ;;  %v461_v51 = vadd.f32 %v766_v24, %v460_v34 }
  0xfd   : > { %v456_v41 = vadd.f32 %v859_v37, %v766_v24  ;;  %v447_v42 = vpop.f32.mrb[3].mxu0  ;;  %v463_v46 = vpop.f32.mrb[3].mxu1  ;;  %v472_v52 = vadd.f32 %v863_v39, %v766_v24  ;;  %v559_v54 = vmul.f32 %v789_v31, %v453_v35  ;;  %v563_v11 = vmul.f32 %v793_v5, %v469_v49 }
  0xfe   : > { %v557_v47 = vmul.f32 %v787_v33, %v445_v36  ;;  %v448_v48 = vadd.f32 %v766_v24, %v447_v42  ;;  %v464_v53 = vadd.f32 %v766_v24, %v463_v46  ;;  %v561_v4 = vmul.f32 %v791_v57, %v461_v51 }
  0xff   : > { %v813_v50 = vpack.c.bf16 %v456_v41, %v453_v35  ;;  %v823_v58 = vpack.c.bf16 %v472_v52, %v469_v49  ;;  %v560_v61 = vmul.f32 %v790_v38, %v456_v41  ;;  %v581_v1 = vmul.f32 %v559_v54, %v453_v35 }
 0x100   : > { %v808_v55 = vpack.c.bf16 %v448_v48, %v445_v36  ;;  %v558_v56 = vmul.f32 %v788_v43, %v448_v48  ;;  %v818_v59 = vpack.c.bf16 %v464_v53, %v461_v51  ;;  %v579_v60 = vmul.f32 %v557_v47, %v445_v36 }
 0x101   : > { %825 = vst [vmem:[%s296_s24 + $0x8] sm:$0xff] %v813_v50   ;;  %827 = vst [vmem:[%s296_s24 + $0x18] sm:$0xff] %v823_v58   ;;  %v582_v6 = vmul.f32 %v560_v61, %v456_v41  ;;  %v562_v9 = vmul.f32 %v792_v0, %v464_v53  ;;  %v583_v13 = vmul.f32 %v561_v4, %v461_v51 }
 0x102   : > { %809 = vst [vmem:[%s296_s24] sm:$0xff] %v808_v55   ;;  %v565_v62 = vadd.f32 %v558_v56, %v557_v47  ;;  %v580_v63 = vmul.f32 %v558_v56, %v448_v48  ;;  %826 = vst [vmem:[%s296_s24 + $0x10] sm:$0xff] %v818_v59   ;;  %v564_v16 = vmul.f32 %v794_v10, %v472_v52 }
 0x103   : > { %v584_v18 = vmul.f32 %v562_v9, %v464_v53  ;;  %v585_v19 = vmul.f32 %v563_v11, %v469_v49 }
 0x104   : > { %v566_v2 = vadd.f32 %v565_v62, %v559_v54  ;;  %v587_v3 = vadd.f32 %v580_v63, %v579_v60  ;;  %v586_v22 = vmul.f32 %v564_v16, %v472_v52 }
 0x106   : > { %v588_v7 = vadd.f32 %v587_v3, %v581_v1  ;;  %v567_v8 = vadd.f32 %v566_v2, %v560_v61 }
 0x108   : > { %v568_v12 = vadd.f32 %v567_v8, %v561_v4  ;;  %v589_v14 = vadd.f32 %v588_v7, %v582_v6 }
 0x10a   : > { %v590_v15 = vadd.f32 %v589_v14, %v583_v13  ;;  %v569_v17 = vadd.f32 %v568_v12, %v562_v9 }
 0x10c   : > { %v570_v20 = vadd.f32 %v569_v17, %v563_v11  ;;  %v591_v21 = vadd.f32 %v590_v15, %v584_v18 }
 0x10e   : > { %v571_v23 = vadd.f32 %v570_v20, %v564_v16  ;;  %v592_v24 = vadd.f32 %v591_v21, %v585_v19 }
 0x110   : > { %v572_v25 = vrot.slane %v571_v23, 4  ;;  %v593_v26 = vadd.f32 %v592_v24, %v586_v22 }
 0x112   : > { %v573_v27 = vadd.f32 %v572_v25, %v571_v23  ;;  %v594_v28 = vrot.slane %v593_v26, 4 }
 0x114   : > { %v574_v29 = vrot.slane %v573_v27, 2  ;;  %v595_v30 = vadd.f32 %v594_v28, %v593_v26 }
 0x116   : > { %v575_v31 = vadd.f32 %v574_v29, %v573_v27  ;;  %v596_v32 = vrot.slane %v595_v30, 2 }
 0x118   : > { %v576_v33 = vrot.slane %v575_v31, 1  ;;  %v597_v34 = vadd.f32 %v596_v32, %v595_v30 }
 0x11a   : > { %v577_v35 = vadd.f32 %v576_v33, %v575_v31  ;;  %v598_v36 = vrot.slane %v597_v34, 1 }
 0x11c   : > { %578 = vst [vmem:[%s304_s27] sm:$0x1] %v577_v35  ;;  %v599_v37 = vadd.f32 %v598_v36, %v597_v34 }
 0x11e   : > { %600 = vst [vmem:[%s304_s27 + $0x1] sm:$0x1] %v599_v37 }
 0x11f PF: > { %s15_s17 = sadd.s32 1, %s939_s17   ;;  %s1056_s15 = smov %s935_s16 }
 0x120   : > { %p12_p6 = scmp.ge.s32.totalorder %s15_s17, 4   ;;  %s1057_s16 = smov %s1059_s18 }
 0x122   :  { %14 = sbr.rel (!%p12_p6) target bundleno = 2 (0x2), region = 80 }

</bundles_post_ra>
